<compile_context>
chip_gen: v7x
topology: tpu7x:2x2x1
jax: 0.10.0
libtpu: 0.0.40
codegen_flags: <defaults>
</compile_context>

<pallas_src>
import functools
import math

import jax
import jax.numpy as jnp
from jax import lax
from jax.experimental import pallas as pl
from jax.experimental.pallas import tpu as pltpu

LEAKY_SLOPE = 0.01
BN_EPS = 1e-5
LN_EPS = 1e-5
TILE_M = 512  # row tile for dense kernels (multiple of 8)


def _round_up(x, m):
    return ((x + m - 1) // m) * m


# ----------------------------------------------------------------------------
# Pallas kernels
# ----------------------------------------------------------------------------
def linear_kernel(x_ref, w_ref, b_ref, o_ref, *, act):
    y = jnp.dot(x_ref[...], w_ref[...], preferred_element_type=jnp.float32) + b_ref[...]
    if act == "tanh":
        y = jnp.tanh(y)
    elif act == "relu":
        y = jnp.maximum(y, 0.0)
    o_ref[...] = y


def linear_stats_kernel(x_ref, w_ref, b_ref, y_ref, stat_ref, *, valid_rows, tile_m):
    """Linear layer that also emits per-tile (sum, sum_sq) over valid rows so the
    following BatchNorm's batch statistics need no extra HBM pass over y."""
    y = jnp.dot(x_ref[...], w_ref[...], preferred_element_type=jnp.float32) + b_ref[...]
    y_ref[...] = y
    row0 = pl.program_id(0) * tile_m
    rid = row0 + lax.broadcasted_iota(jnp.int32, y.shape, 0)
    ym = jnp.where(rid < valid_rows, y, 0.0)          # mask out padded rows
    s1 = jnp.sum(ym, axis=0, keepdims=True)
    s2 = jnp.sum(ym * ym, axis=0, keepdims=True)
    stat_ref[0] = jnp.concatenate([s1, s2], axis=0)   # (2, nout)


def layernorm_kernel(x_ref, g_ref, b_ref, o_ref):
    x = x_ref[...]
    mu = jnp.mean(x, axis=-1, keepdims=True)
    var = jnp.mean((x - mu) ** 2, axis=-1, keepdims=True)
    o_ref[...] = (x - mu) * lax.rsqrt(var + LN_EPS) * g_ref[...] + b_ref[...]


def graph_block_kernel(xp_ref, mp_ref, eye_ref, mask_ref, a_ref, b_ref, h_ref,
                       *, win, seq):
    """One batch element, all `seq` graphs at once.

    xp_ref : (1, Tp, S, D)  zero-padded raw input slab
    mp_ref : (1, Tp, S, D)  padded slab after the Dot_Graph mapping (x@Wm+bm)
    Builds the win-window node sets in-kernel (no HBM unfold replication),
    forms Adj = softmax(leaky_relu(M M^T - 1e8 I)) + I, applies the decay mask,
    and outputs h = Adj @ BN(X) for every graph: (1, T, N, D).
    """
    if win == 1:
        xg = xp_ref[0]                                   # (T, S=N, D)
        mg = mp_ref[0]
    else:
        xg = jnp.concatenate([xp_ref[0, w:w + seq] for w in range(win)], axis=1)
        mg = jnp.concatenate([mp_ref[0, w:w + seq] for w in range(win)], axis=1)
    # Adjacency per graph, batched over the time axis: (T, N, N)
    adj = lax.dot_general(mg, mg, (((2,), (2,)), ((0,), (0,))),
                          preferred_element_type=jnp.float32)
    eye = eye_ref[...]
    adj = adj - eye * 1e8
    adj = jnp.where(adj > 0, adj, LEAKY_SLOPE * adj)     # F.leaky_relu
    m = jnp.max(adj, axis=-1, keepdims=True)
    e = jnp.exp(adj - m)
    adj = e / jnp.sum(e, axis=-1, keepdims=True)         # softmax(dim=-1)
    adj = (adj + eye) * mask_ref[...]                    # + I, * pre_relation
    # BatchNorm1d on input features folded to per-channel affine (a, b).
    x_bn = xg * a_ref[...] + b_ref[...]
    h_ref[0] = lax.dot_general(adj, x_bn, (((2,), (1,)), ((0,), (0,))),
                               preferred_element_type=jnp.float32)   # (T, N, D)


def bn_pool_kernel(h_ref, a_ref, b_ref, o_ref, *, win, sensors):
    """bn1 affine + leaky_relu + mean pool over the time window, all T graphs."""
    y = h_ref[0] * a_ref[...] + b_ref[...]
    y = jnp.where(y > 0, y, LEAKY_SLOPE * y)
    acc = y[:, 0:sensors, :]
    for w in range(1, win):
        acc = acc + y[:, w * sensors:(w + 1) * sensors, :]
    o_ref[0] = acc * (1.0 / win)


# ----------------------------------------------------------------------------
# Pallas wrappers
# ----------------------------------------------------------------------------
def linear_pallas(x, w, b, act="none", tile_m=TILE_M):
    lead, k = x.shape[:-1], x.shape[-1]
    x2 = x.reshape(-1, k).astype(jnp.float32)
    m, nout = x2.shape[0], w.shape[1]
    tm = min(tile_m, _round_up(m, 8))
    mp = _round_up(m, tm)
    if mp != m:
        x2 = jnp.pad(x2, ((0, mp - m), (0, 0)))
    y = pl.pallas_call(
        functools.partial(linear_kernel, act=act),
        grid=(mp // tm,),
        in_specs=[pl.BlockSpec((tm, k), lambda i: (i, 0)),
                  pl.BlockSpec((k, nout), lambda i: (0, 0)),
                  pl.BlockSpec((1, nout), lambda i: (0, 0))],
        out_specs=pl.BlockSpec((tm, nout), lambda i: (i, 0)),
        out_shape=jax.ShapeDtypeStruct((mp, nout), jnp.float32),
        compiler_params=pltpu.CompilerParams(dimension_semantics=("parallel",)),
    )(x2, w.astype(jnp.float32), b.reshape(1, nout).astype(jnp.float32))
    if mp != m:
        y = y[:m]
    return y.reshape(lead + (nout,))


def linear_stats_pallas(x2, w, b, tile_m=TILE_M):
    """y = x2 @ w + b and (sum, sum_sq) of y over all rows, fused in one pass."""
    m, k = x2.shape
    nout = w.shape[1]
    tm = min(tile_m, _round_up(m, 8))
    mp = _round_up(m, tm)
    x2p = jnp.pad(x2, ((0, mp - m), (0, 0))) if mp != m else x2
    nblk = mp // tm
    y, stats = pl.pallas_call(
        functools.partial(linear_stats_kernel, valid_rows=m, tile_m=tm),
        grid=(nblk,),
        in_specs=[pl.BlockSpec((tm, k), lambda i: (i, 0)),
                  pl.BlockSpec((k, nout), lambda i: (0, 0)),
                  pl.BlockSpec((1, nout), lambda i: (0, 0))],
        out_specs=(pl.BlockSpec((tm, nout), lambda i: (i, 0)),
                   pl.BlockSpec((1, 2, nout), lambda i: (i, 0, 0))),
        out_shape=(jax.ShapeDtypeStruct((mp, nout), jnp.float32),
                   jax.ShapeDtypeStruct((nblk, 2, nout), jnp.float32)),
        compiler_params=pltpu.CompilerParams(dimension_semantics=("parallel",)),
    )(x2p.astype(jnp.float32), w.astype(jnp.float32),
      b.reshape(1, nout).astype(jnp.float32))
    if mp != m:
        y = y[:m]
    return y, jnp.sum(stats[:, 0], axis=0), jnp.sum(stats[:, 1], axis=0)


def layernorm_pallas(x, gamma, beta, tile_m=TILE_M):
    lead, h = x.shape[:-1], x.shape[-1]
    x2 = x.reshape(-1, h).astype(jnp.float32)
    m = x2.shape[0]
    tm = min(tile_m, _round_up(m, 8))
    mp = _round_up(m, tm)
    if mp != m:
        x2 = jnp.pad(x2, ((0, mp - m), (0, 0)))
    y = pl.pallas_call(
        layernorm_kernel,
        grid=(mp // tm,),
        in_specs=[pl.BlockSpec((tm, h), lambda i: (i, 0)),
                  pl.BlockSpec((1, h), lambda i: (0, 0)),
                  pl.BlockSpec((1, h), lambda i: (0, 0))],
        out_specs=pl.BlockSpec((tm, h), lambda i: (i, 0)),
        out_shape=jax.ShapeDtypeStruct((mp, h), jnp.float32),
        compiler_params=pltpu.CompilerParams(dimension_semantics=("parallel",)),
    )(x2, gamma.reshape(1, h), beta.reshape(1, h))
    if mp != m:
        y = y[:m]
    return y.reshape(lead + (h,))


def linear_xla(x, w, b):
    # Tiny output heads (n_emo=7 / n_cos=3 lanes): left in plain XLA — a Pallas
    # store that narrow is all masked vst.msk with mostly-empty vregs.
    return jnp.dot(x, w) + b


# ----------------------------------------------------------------------------
# GraphConvpoolMPNN_block_v6
# (Conv_GraphST + Dot_Graph_Construction + MPNN k=1 + mean pool)
# ----------------------------------------------------------------------------
def mpnn_block(x, p, *, win, num_sensors, decay):
    b, t, s, d = x.shape
    assert s == num_sensors
    dout = p["Wt"].shape[1]
    n = win * s
    pd = (win - 1) // 2
    tp = t + 2 * pd

    xp = jnp.pad(x, ((0, 0), (pd, pd), (0, 0), (0, 0))).astype(jnp.float32)

    # self.BN (BatchNorm1d on input features), training-mode stats over the
    # *unfolded* tensor (including zero-padded frames), computed without ever
    # materializing the unfold: each padded timestep tp appears c[tp] times.
    tpi = jnp.arange(tp)[:, None]
    wdi = jnp.arange(win)[None, :]
    c = jnp.sum(((tpi - wdi >= 0) & (tpi - wdi < t)).astype(jnp.float32), axis=1)
    total = float(b * t * win * s)
    wsum = jnp.einsum('p,bpsd->d', c, xp)
    wsq = jnp.einsum('p,bpsd->d', c, xp * xp)
    mean_in = wsum / total
    var_in = jnp.maximum(wsq / total - mean_in ** 2, 0.0)
    a_in = p["bn_in_g"] / jnp.sqrt(var_in + BN_EPS)
    b_in = p["bn_in_b"] - mean_in * a_in

    # Dot_Graph_Construction mapping as one dense row-tiled GEMM over all
    # (padded) nodes; zero-padded frames correctly map to the bias bm.
    mapped_p = linear_pallas(xp, p["Wm"], p["bm"])                  # (B, Tp, S, D)

    # Decay mask / identity hoisted out of the kernel body.
    ti = jnp.repeat(jnp.arange(win), s).astype(jnp.float32)
    mask = jnp.power(jnp.float32(decay), jnp.abs(ti[:, None] - ti[None, :]))
    eye = jnp.eye(n, dtype=jnp.float32)

    h = pl.pallas_call(
        functools.partial(graph_block_kernel, win=win, seq=t),
        grid=(b,),
        in_specs=[
            pl.BlockSpec((1, tp, s, d), lambda i: (i, 0, 0, 0)),
            pl.BlockSpec((1, tp, s, d), lambda i: (i, 0, 0, 0)),
            pl.BlockSpec((n, n), lambda i: (0, 0)),
            pl.BlockSpec((n, n), lambda i: (0, 0)),
            pl.BlockSpec((1, d), lambda i: (0, 0)),
            pl.BlockSpec((1, d), lambda i: (0, 0)),
        ],
        out_specs=pl.BlockSpec((1, t, n, d), lambda i: (i, 0, 0, 0)),
        out_shape=jax.ShapeDtypeStruct((b, t, n, d), jnp.float32),
        compiler_params=pltpu.CompilerParams(dimension_semantics=("parallel",)),
    )(xp, mapped_p, eye, mask, a_in.reshape(1, d), b_in.reshape(1, d))

    # theta projection as one GEMM, emitting bn1 partial stats in the same pass.
    theta_out, s1, s2 = linear_stats_pallas(h.reshape(b * t * n, d), p["Wt"], p["bt"])
    count = float(b * t * n)
    mean1 = s1 / count
    var1 = jnp.maximum(s2 / count - mean1 ** 2, 0.0)
    a1 = p["bn1_g"] / jnp.sqrt(var1 + BN_EPS)
    b1 = p["bn1_b"] - mean1 * a1

    pooled = pl.pallas_call(
        functools.partial(bn_pool_kernel, win=win, sensors=s),
        grid=(b,),
        in_specs=[
            pl.BlockSpec((1, t, n, dout), lambda i: (i, 0, 0, 0)),
            pl.BlockSpec((1, dout), lambda i: (0, 0)),
            pl.BlockSpec((1, dout), lambda i: (0, 0)),
        ],
        out_specs=pl.BlockSpec((1, t, s, dout), lambda i: (i, 0, 0, 0)),
        out_shape=jax.ShapeDtypeStruct((b, t, s, dout), jnp.float32),
        compiler_params=pltpu.CompilerParams(dimension_semantics=("parallel",)),
    )(theta_out.reshape(b, t, n, dout), a1.reshape(1, dout), b1.reshape(1, dout))
    return pooled                                                    # (B, T, S, Dout)


# ----------------------------------------------------------------------------
# Auxiliary pieces (glue)
# ----------------------------------------------------------------------------
def make_positional_encoding(d_model, max_len=5000):
    pos = jnp.arange(max_len, dtype=jnp.float32)[:, None]
    div = jnp.exp(jnp.arange(0, d_model, 2, dtype=jnp.float32) * -(math.log(100.0) / d_model))
    pe = jnp.zeros((max_len, d_model), jnp.float32)
    pe = pe.at[:, 0::2].set(jnp.sin(pos * div)).at[:, 1::2].set(jnp.cos(pos * div))
    return pe


def lstm_bidirectional(x, p, hidden):
    # TODO(synk): the sequential LSTM recurrence stays in plain JAX (lax.scan);
    # the per-timestep input projections run through the Pallas linear kernel.
    b, t, d = x.shape

    def run_dir(xd, wih, bih, whh, bhh):
        xproj = linear_pallas(xd, wih, bih + bhh).reshape(b, t, 4 * hidden)

        def step(carry, xt):
            h, c = carry
            gates = xt + h @ whh
            i, f, g, o = jnp.split(gates, 4, axis=-1)
            i, f, o = jax.nn.sigmoid(i), jax.nn.sigmoid(f), jax.nn.sigmoid(o)
            g = jnp.tanh(g)
            c = f * c + i * g
            h = o * jnp.tanh(c)
            return (h, c), h

        h0 = jnp.zeros((b, hidden), jnp.float32)
        _, hs = lax.scan(step, (h0, h0), jnp.swapaxes(xproj, 0, 1))
        return jnp.swapaxes(hs, 0, 1)

    fwd = run_dir(x, p["Wih_f"], p["bih_f"], p["Whh_f"], p["bhh_f"])
    bwd = run_dir(x[:, ::-1], p["Wih_b"], p["bih_b"], p["Whh_b"], p["bhh_b"])[:, ::-1]
    return jnp.concatenate([fwd, bwd], axis=-1)


def cross_entropy_ignore(logits, targets, ignore_index=-1):
    valid = targets != ignore_index
    safe_t = jnp.where(valid, targets, 0)
    logp = jax.nn.log_softmax(logits, axis=-1)
    nll = -jnp.take_along_axis(logp, safe_t[:, None], axis=-1)[:, 0]
    nll = jnp.where(valid, nll, 0.0)
    # PyTorch returns NaN when every target is ignored; guard with max(count, 1).
    return jnp.sum(nll) / jnp.maximum(jnp.sum(valid.astype(jnp.float32)), 1.0)


# ----------------------------------------------------------------------------
# STGraph forward (select_modality='TAV', task='ECPF')
# ----------------------------------------------------------------------------
def stgraph_forward(params, cfg, pooler_output, video_feature, audio_feature,
                    emotion_ids, emotion_mask, cos_ids, cos_mask):
    # TODO(synk): BertModel/AutoTokenizer (get_pooler_output) is an external
    # pretrained encoder; its pooled output is provided as a direct input here.
    h = cfg["hidden"]
    b, t, _ = pooler_output.shape
    s = cfg["num_node"]

    flat_v = linear_pallas(video_feature, params["Wv"], params["bv"])
    flat_a = linear_pallas(audio_feature, params["Wa"], params["ba"])
    mm = jnp.stack([pooler_output, flat_v, flat_a], axis=2)          # (B, T, 3, H)
    mm = layernorm_pallas(mm, params["ln_g"], params["ln_b"])

    # Positional encoding (Dropout p=0.1 is identity in eval mode).
    mf = jnp.transpose(mm, (0, 2, 1, 3)).reshape(b * s, t, h)
    mf = mf + params["pe"][None, :t, :]
    mm = jnp.transpose(mf.reshape(b, s, t, h), (0, 2, 1, 3))          # (B, T, S, H)

    mmf_1 = mpnn_block(mm, params["MPNN1"], win=1, num_sensors=s, decay=0.7)
    mmf_2 = mpnn_block(mm, params["MPNN2"], win=3, num_sensors=s, decay=0.7)

    def fuse(mmf):
        f = mmf.reshape(b, t, s * h)
        y = linear_pallas(f, params["sf_W1"], params["sf_b1"], act="tanh")
        return linear_pallas(y, params["sf_W2"], params["sf_b2"])

    # The reference code feeds self.MPNN2 for mmf_3/4/5 too; the fused results are
    # identical, so compute once and reuse (XLA does not CSE across pallas_calls).
    fuse_1 = fuse(mmf_1)
    fuse_2 = fuse(mmf_2)
    mm_cat = jnp.concatenate([fuse_1, fuse_2, fuse_2, fuse_2, fuse_2], axis=-1)

    y = linear_pallas(mm_cat, params["fc_W1"], params["fc_b1"], act="tanh")
    mm_feas = linear_pallas(y, params["fc_W2"], params["fc_b2"])      # (B, T, 2H)
    lstm_out = lstm_bidirectional(mm_feas, params["rnn"], h)          # (B, T, 2H)

    # ----- task == 'ECPF' branch -----
    emo_feature = linear_pallas(
        linear_pallas(lstm_out, params["fe_W1"], params["fe_b1"], act="tanh"),
        params["fe_W2"], params["fe_b2"])
    utt_feature = linear_pallas(
        linear_pallas(lstm_out, params["fu_W1"], params["fu_b1"], act="tanh"),
        params["fu_W2"], params["fu_b2"])
    emo_hidden = linear_pallas(emo_feature, params["em_W1"], params["em_b1"], act="relu")
    emo_scores = linear_xla(emo_hidden, params["em_W2"], params["em_b2"])  # (B, T, n_emo)

    mask1 = emotion_mask
    emotion_ids = jnp.where(mask1 == 0, -1, emotion_ids)
    loss_emo = cross_entropy_ignore(emo_scores.reshape(-1, emo_scores.shape[-1]),
                                    emotion_ids.reshape(-1))
    pred_emos = jnp.argmax(emo_scores, axis=2).astype(jnp.int32)
    pred_emos = jnp.where(mask1 == 0, 0, pred_emos)

    emo_rep = jnp.broadcast_to(emo_feature[:, :, None, :], (b, t, t, h))
    utt_rep = jnp.broadcast_to(utt_feature[:, None, :, :], (b, t, t, h))
    emo_used = (pred_emos > 0).astype(jnp.int32)[:, :, None]
    emo_used_rep = jnp.broadcast_to(emo_used, (b, t, t))
    cos_feature = jnp.concatenate([emo_rep, utt_rep], axis=3)         # (B, T, T, 2H)
    cos_hidden = linear_pallas(cos_feature, params["cm_W1"], params["cm_b1"], act="relu")
    cos_score = linear_xla(cos_hidden, params["cm_W2"], params["cm_b2"])  # (B, T, T, n_cos)
    pred_cos = jnp.argmax(cos_score, axis=3).astype(jnp.int32)

    mask2 = cos_mask * emo_used_rep
    cos_mask_ids = jnp.where(mask2 == 0, -1, cos_ids)
    loss_cos = cross_entropy_ignore(cos_score.reshape(-1, cos_score.shape[-1]),
                                    cos_mask_ids.reshape(-1))
    loss = (loss_emo + loss_cos) / 2.0

    emo_used3 = (emotion_ids > 0).astype(jnp.int32)[:, :, None]
    mask3 = cos_mask * jnp.broadcast_to(emo_used3, (b, t, t))
    cos_ids_out = jnp.where(mask3 == 0, -1, cos_ids)
    mask4 = emo_used_rep * jnp.triu(jnp.ones((t, t), jnp.int32), k=1)[None]
    pred_cos = jnp.where(mask4 == 0, -1, pred_cos)

    return loss, pred_emos, emotion_ids, pred_cos, cos_ids_out


# ----------------------------------------------------------------------------
# Deterministic parameter init
# ----------------------------------------------------------------------------
def init_params(key, cfg):
    h, vd, ad = cfg["hidden"], cfg["video"], cfg["audio"]
    ne, nc, s = cfg["n_emo"], cfg["n_cos"], cfg["num_node"]
    ks = iter(jax.random.split(key, 64))

    def w(shape, scale=0.05):
        return scale * jax.random.normal(next(ks), shape, jnp.float32)

    def mpnn_p():
        return {"Wm": w((h, h)), "bm": w((h,)),
                "bn_in_g": jnp.ones((h,), jnp.float32), "bn_in_b": jnp.zeros((h,), jnp.float32),
                "Wt": w((h, h)), "bt": w((h,)),
                "bn1_g": jnp.ones((h,), jnp.float32), "bn1_b": jnp.zeros((h,), jnp.float32)}

    return {
        "Wv": w((vd, h)), "bv": w((h,)),
        "Wa": w((ad, h)), "ba": w((h,)),
        "ln_g": jnp.ones((h,), jnp.float32), "ln_b": jnp.zeros((h,), jnp.float32),
        "pe": make_positional_encoding(h),
        "MPNN1": mpnn_p(), "MPNN2": mpnn_p(),
        "sf_W1": w((s * h, 2 * h)), "sf_b1": w((2 * h,)),
        "sf_W2": w((2 * h, h)), "sf_b2": w((h,)),
        "fc_W1": w((5 * h, 2 * h)), "fc_b1": w((2 * h,)),
        "fc_W2": w((2 * h, 2 * h)), "fc_b2": w((2 * h,)),
        "rnn": {"Wih_f": w((2 * h, 4 * h)), "bih_f": w((4 * h,)),
                "Whh_f": w((h, 4 * h)), "bhh_f": w((4 * h,)),
                "Wih_b": w((2 * h, 4 * h)), "bih_b": w((4 * h,)),
                "Whh_b": w((h, 4 * h)), "bhh_b": w((4 * h,))},
        "fe_W1": w((2 * h, h)), "fe_b1": w((h,)),
        "fe_W2": w((h, h)), "fe_b2": w((h,)),
        "fu_W1": w((2 * h, h)), "fu_b1": w((h,)),
        "fu_W2": w((h, h)), "fu_b2": w((h,)),
        "em_W1": w((h, h)), "em_b1": w((h,)),
        "em_W2": w((h, ne)), "em_b2": w((ne,)),
        "cm_W1": w((2 * h, h)), "cm_b1": w((h,)),
        "cm_W2": w((h, nc)), "cm_b2": w((nc,)),
    }


if __name__ == "__main__":
    cfg = {"hidden": 32, "video": 48, "audio": 40, "num_node": 3, "n_emo": 7, "n_cos": 3}
    B, T = 2, 8
    key = jax.random.PRNGKey(0)
    k_par, k_p, k_v, k_a, k_e, k_c = jax.random.split(key, 6)

    params = init_params(k_par, cfg)
    pooler = jax.random.normal(k_p, (B, T, cfg["hidden"]), jnp.float32)
    video = jax.random.normal(k_v, (B, T, cfg["video"]), jnp.float32)
    audio = jax.random.normal(k_a, (B, T, cfg["audio"]), jnp.float32)
    emotion_ids = jax.random.randint(k_e, (B, T), 0, cfg["n_emo"], jnp.int32)
    emotion_mask = jnp.ones((B, T), jnp.int32)
    cos_ids = jax.random.randint(k_c, (B, T, T), 0, cfg["n_cos"], jnp.int32)
    cos_mask = jnp.ones((B, T, T), jnp.int32)

    outs = stgraph_forward(params, cfg, pooler, video, audio,
                           emotion_ids, emotion_mask, cos_ids, cos_mask)
    outs = jax.block_until_ready(outs)
    print("KERNEL_OK")
</pallas_src>

<mosaic_0001>
module attributes {stable_mosaic.version = 11 : i64} {
  func.func @linear_kernel(%arg0: i32, %arg1: memref<16x48xf32, #tpu.memory_space<vmem>>, %arg2: memref<48x32xf32, #tpu.memory_space<vmem>>, %arg3: memref<1x32xf32, #tpu.memory_space<vmem>>, %arg4: memref<16x32xf32, #tpu.memory_space<vmem>>) attributes {dimension_semantics = [#tpu.dimension_semantics<parallel>], iteration_bounds = array<i64: 1>, scalar_prefetch = 0 : i64, scratch_operands = 0 : i64, tpu.core_type = #tpu.core_type<tc>, window_params = [{transform_indices = @transform_0, window_bounds = array<i64: 16, 48>}, {pipeline_mode = #tpu.pipeline_mode<synchronous>, transform_indices = @transform_1, window_bounds = array<i64: 48, 32>}, {pipeline_mode = #tpu.pipeline_mode<synchronous>, transform_indices = @transform_2, window_bounds = array<i64: 1, 32>}, {transform_indices = @transform_3, window_bounds = array<i64: 16, 32>}]} {
    %c0 = arith.constant 0 : index
    %c0_0 = arith.constant 0 : index
    %0 = vector.load %arg1[%c0, %c0_0] : memref<16x48xf32, #tpu.memory_space<vmem>>, vector<16x48xf32>
    %c0_1 = arith.constant 0 : index
    %c0_2 = arith.constant 0 : index
    %1 = vector.load %arg2[%c0_1, %c0_2] : memref<48x32xf32, #tpu.memory_space<vmem>>, vector<48x32xf32>
    %cst = arith.constant dense<0.000000e+00> : vector<16x32xf32>
    %2 = tpu.matmul %0, %1, %cst {dimension_numbers = #tpu.dot_dimension_numbers<[1], [0], [0], [1], [0, 0, 1, 1], [], []>} : vector<16x48xf32>, vector<48x32xf32>, vector<16x32xf32> -> vector<16x32xf32>
    %c0_3 = arith.constant 0 : index
    %c0_4 = arith.constant 0 : index
    %3 = vector.load %arg3[%c0_3, %c0_4] : memref<1x32xf32, #tpu.memory_space<vmem>>, vector<1x32xf32>
    %4 = vector.broadcast %3 : vector<1x32xf32> to vector<16x32xf32>
    %5 = arith.addf %2, %4 : vector<16x32xf32>
    %c0_5 = arith.constant 0 : index
    %c0_6 = arith.constant 0 : index
    %6 = vector.load %arg4[%c0_5, %c0_6] : memref<16x32xf32, #tpu.memory_space<vmem>>, vector<16x32xf32>
    tpu.vector_store %arg4[%c0_5, %c0_6], %5 {strides = array<i32>} : memref<16x32xf32, #tpu.memory_space<vmem>>, vector<16x32xf32>,
    return
  }
  func.func @transform_0(%arg0: i32) -> (i32, i32) {
    %c0_i32 = arith.constant 0 : i32
    %c0_i32_0 = arith.constant 0 : i32
    return %arg0, %c0_i32 : i32, i32
  }
  func.func @transform_1(%arg0: i32) -> (i32, i32) {
    %c0_i32 = arith.constant 0 : i32
    %c0_i32_0 = arith.constant 0 : i32
    %c0_i32_1 = arith.constant 0 : i32
    return %c0_i32, %c0_i32_0 : i32, i32
  }
  func.func @transform_2(%arg0: i32) -> (i32, i32) {
    %c0_i32 = arith.constant 0 : i32
    %c0_i32_0 = arith.constant 0 : i32
    %c0_i32_1 = arith.constant 0 : i32
    return %c0_i32, %c0_i32_0 : i32, i32
  }
  func.func @transform_3(%arg0: i32) -> (i32, i32) {
    %c0_i32 = arith.constant 0 : i32
    %c0_i32_0 = arith.constant 0 : i32
    return %arg0, %c0_i32 : i32, i32
  }
}

</mosaic_0001>

<bundles_post_ra>
// kernel: tpu_custom_call.1
= control target key start
LH: loop header
LB: loop body
LE: loop exit
PB: predicated region body
PF: predicated region fallthrough
CT: control target
= control target key end

     0   :  { %vm30_vm0 = vcmask 392192   ;;  %s260_s0 = inlined_call_operand.vmem [shape: f32[16,48], index: 0, kind: input, shape index: {}]   ;;  %s261_s1 = inlined_call_operand.vmem [shape: f32[48,32], index: 1, kind: input, shape index: {}]   ;;  %s262_s2 = inlined_call_operand.vmem [shape: f32[1,32], index: 2, kind: input, shape index: {}]   ;;  %s263_s3 = inlined_call_operand.hbm [shape: f32[16,32], index: 3, kind: output, shape index: {}]  }
   0x1   :  { %v17_v0 = vld [vmem:[%s261_s1] sm:$0xff]  ;;  %v18_v1 = vld [vmem:[%s261_s1 + $0x8] sm:$0xff]  ;;  %v19_v2 = vld [vmem:[%s261_s1 + $0x10] sm:$0xff] }
   0x2   :  { %v157_v3 = vpack.c.bf16 %v18_v1, %v17_v0  ;;  %v20_v4 = vld [vmem:[%s261_s1 + $0x18] sm:$0xff]  ;;  %v21_v5 = vld [vmem:[%s261_s1 + $0x20] sm:$0xff]  ;;  %v22_v7 = vld [vmem:[%s261_s1 + $0x28] sm:$0xff] }
   0x3   :  { %v161_v6 = vpack.c.bf16 %v20_v4, %v19_v2  ;;  %v15_v8 = vld [vmem:[%s260_s0] sm:$0xff] }
   0x4   :  { %8 = vsyncpa [#allocation3], 0  ;;  %158 = vmatprep.subr.bf16.mxu0 %v157_v3  ;;  %154 = vmatprep.mubr.msk.f32.mxu0 %vm30_vm0, %v15_v8  ;;  %v165_v9 = vpack.c.bf16 %v22_v7, %v21_v5  ;;  %v16_v10 = vld [vmem:[%s260_s0 + $0x8] sm:$0xff]  ;;  %v131_v11 = vld [vmem:[%s262_s2] ss:$0 sm:$0xff]  ;;  %s196_s29 = smov [#allocation2]  }
   0x5   :  { %160 = vmatpush3.bf16.msra.mxu0 %v157_v3  ;;  %s120_s30 = sshll.u32 %s196_s29, 4  ;;  %vm112_vm1 = vcmask 261120   ;;  %s121_s30 = int_to_ptr.vmem [resolvable:$true] %s120_s30 }
   0x6   :  { %162 = vmatprep.subr.bf16.mxu0 %v161_v6  ;;  %s172_s4 = scalar_lea.vmem %s121_s30, 256  ;;  %p177_p1 = scmp.lt.s32.totalorder %s121_s30, %s121_s30 }
   0x7   :  { %p173_p0 = scmp.ne.s32.totalorder %s121_s30, %s172_s4  ;;  %p178_p2 = scmp.lt.s32.totalorder %s172_s4, %s172_s4 }
   0x9   :  { %164 = vmatpush3.bf16.msra.mxu0 %v161_v6  ;;  %p179_p3 = por %p178_p2, %p177_p1 }
   0xa   :  { %166 = vmatprep.subr.bf16.mxu0 %v165_v9 }
   0xb   :  { %p180_p4 = pnand %p179_p3, %p173_p0 }
   0xd   :  { %168 = vmatpush3.bf16.msra.mxu0 %v165_v9 }
  0x10   :  { %155 = vmatmul.mubr.msk.f32.vlgmr.msra.gmra.mrb[0].mxu0 %vm30_vm0, %v16_v10 }
  0xe3   :  { %v156_v12 = vpop.f32.mrb[0].mxu0 }
  0xe4   :  { %v109_v13 = vadd.f32 %v156_v12, %v131_v11  ;;  %v103_v14 = vpop.f32.mrb[1].mxu0 }
  0xe5   :  { %v104_v15 = vadd.f32 %v131_v11, %v103_v14 }
  0xe6   :  { %114 = vst.msk [vmem:[#allocation2 + $0x8] sm:$0xff] %vm112_vm1, %v109_v13 }
  0xe7   :  { %113 = vst.msk [vmem:[#allocation2] sm:$0xff] %vm112_vm1, %v104_v15 }
  0xe8   :  { %183 = shalt.err (!%p180_p4)
}
  0xe9   :  { %s184_s2 = scalar_lea.hbm %s263_s3, 256 }
  0xea   :  { %p185_p5 = scmp.ne.s32.totalorder %s263_s3, %s184_s2  ;;  %p188_p6 = scmp.lt.u32.totalorder %s184_s2, %s263_s3 }
  0xec   :  { %p190_p7 = pnand %p188_p6, %p185_p5 }
  0xee   :  { %193 = shalt.err (!%p190_p7)
}
  0xef   :  { %s197_s10 = smov 128   ;;  %s198_s11 = smov 8  }
  0xf0   :  { %126 = dma.vmem_to_hbm [thread:$0]  %s121_s30, 256, %s263_s3, [#allocation3], %s197_s10, %s197_s10, %s198_s11  }
  0xf1   :  { %194 = dma.done.wait [#allocation3], 256  }
  0xf2   :  { %195 = vsyncadd [#allocation3], 4294967040 }
  0xf3   :  { %130 = vsyncpa [#allocation3], 1 }

</bundles_post_ra>
